<compile_context>
chip_gen: v5e
topology: v5e:2x2
jax: 0.10.0
libtpu: 0.0.40
codegen_flags: <defaults>
</compile_context>

<pallas_src>
import jax
import jax.numpy as jnp
import numpy as np
from jax import lax
from jax.experimental import pallas as pl
from jax.experimental.pallas import tpu as pltpu

LANES = 1024            # lane-dense last dim (multiple of 128)
SUBLANES = 8
MAX_TILE_ROWS = 1024    # 1024x1024 tile: 4 MiB f32 + 4 MiB int32 per pipeline buffer
NCORES = 2              # leading 'parallel' grid axis (sharded across TCs on v7x)
BIG = 1.0e12
PAD_TARGET = 2          # any target value not in {0, 1} is treated as "ignored"


def _round_up(x, m):
    return ((x + m - 1) // m) * m


def _cdiv(a, b):
    return -(-a // b)


def _make_kernel(tile_rows, valid_rows, inner_tiles):
    g = tile_rows // SUBLANES

    def kernel(pred_ref, tgt_ref, m_ref, sneg_ref, spos_ref):
        c = pl.program_id(0)          # core slice (parallel)
        i = pl.program_id(1)          # row-tile step (arbitrary / reduction)

        @pl.when(i == 0)
        def _init():
            m_ref[...] = jnp.zeros_like(m_ref)        # max starts at 0 (>= appended 0-logit)
            sneg_ref[...] = jnp.zeros_like(sneg_ref)
            spos_ref[...] = jnp.zeros_like(spos_ref)

        tile_start = (c * inner_tiles + i) * tile_rows

        pred = pred_ref[...].astype(jnp.float32)      # (tile_rows, LANES)
        tgt = tgt_ref[...]                            # (tile_rows, LANES) int
        pos = tgt == 1
        neg = tgt == 0
        # multi-label trick: negate positive-class logits; anything not in
        # {0,1} (ignore_index / padding) -> -BIG so its exp is exactly 0.
        y = jnp.where(neg, pred, jnp.where(pos, -pred, jnp.float32(-BIG)))

        def accumulate(y_masked):
            # (tile_rows, LANES) -> (G, 8, LANES): sublane-aligned split, no relayout;
            # reductions over axis 0 are pure elementwise VALU vreg ops.
            y4 = y_masked.reshape(g, SUBLANES, LANES)
            m_old = m_ref[0]                                      # (8, LANES)
            m_new = jnp.maximum(m_old, jnp.max(y4, axis=0))
            scale = jnp.exp(m_old - m_new)
            e = jnp.exp(y4 - m_new[None])                         # one exp per element
            e_neg = jnp.where(neg.reshape(g, SUBLANES, LANES), e, 0.0)
            sneg_ref[0] = sneg_ref[0] * scale + jnp.sum(e_neg, axis=0)
            # e is exactly 0 at ignored/masked positions, so e - e_neg is the
            # positive-class contribution with no extra select.
            spos_ref[0] = spos_ref[0] * scale + jnp.sum(e - e_neg, axis=0)
            m_ref[0] = m_new

        full = tile_start + tile_rows <= valid_rows

        @pl.when(full)
        def _full_tile():                 # common fast path: no masking cost
            accumulate(y)

        @pl.when(jnp.logical_not(full))
        def _ragged_tile():               # boundary tile: mask rows past the array
            row = lax.broadcasted_iota(jnp.int32, (tile_rows, LANES), 0)
            ok = (row + tile_start) < valid_rows
            accumulate(jnp.where(ok, y, jnp.float32(-BIG)))

    return kernel


def multi_label_categorical_cross_entropy(logits, target, ignore_index=-100):
    """logits: float (..., type_size); target: int, same shape, in {0, 1, ignore_index}."""
    assert logits.shape == target.shape
    assert ignore_index not in (0, 1), "kernel treats any value other than 0/1 as ignored"

    n = int(logits.size)
    pred_flat = jnp.ravel(logits)
    if pred_flat.dtype not in (jnp.float32, jnp.bfloat16):
        pred_flat = pred_flat.astype(jnp.float32)     # bf16 passes through untouched
    tgt_flat = jnp.ravel(target)
    if tgt_flat.dtype not in (jnp.int32, jnp.int16, jnp.int8, jnp.uint8):
        tgt_flat = tgt_flat.astype(jnp.int32)         # no int8 re-cast pass: read natively

    rows_exact, rem = divmod(n, LANES)
    if rem == 0 and rows_exact >= SUBLANES:
        rows = rows_exact                              # zero-copy path: reshape only
    else:
        # minimal-pad fallback for ragged sizes (one extra HBM pass; see TODO above)
        rows = max(SUBLANES, _round_up(_cdiv(max(n, 1), LANES), SUBLANES))
        pad = rows * LANES - n
        pred_flat = jnp.pad(pred_flat, (0, pad))
        tgt_flat = jnp.pad(tgt_flat, (0, pad), constant_values=PAD_TARGET)

    pred2 = pred_flat.reshape(rows, LANES)
    tgt2 = tgt_flat.reshape(rows, LANES)

    tile_rows = min(MAX_TILE_ROWS, _round_up(_cdiv(rows, NCORES), SUBLANES))
    total_tiles = _cdiv(rows, tile_rows)
    inner_tiles = _cdiv(total_tiles, NCORES)
    last_block = total_tiles - 1

    def row_map(c, i):
        # clamp so every DMA stays in-bounds; duplicated reads are masked in-kernel
        return (jnp.minimum(c * inner_tiles + i, last_block), 0)

    kernel = _make_kernel(tile_rows, rows, inner_tiles)

    acc_shape = jax.ShapeDtypeStruct((NCORES, SUBLANES, LANES), jnp.float32)
    acc_spec = pl.BlockSpec((1, SUBLANES, LANES), lambda c, i: (c, 0, 0))

    m, sneg, spos = pl.pallas_call(
        kernel,
        out_shape=(acc_shape, acc_shape, acc_shape),
        grid_spec=pltpu.PrefetchScalarGridSpec(
            num_scalar_prefetch=0,
            grid=(NCORES, inner_tiles),
            in_specs=[
                pl.BlockSpec((tile_rows, LANES), row_map),
                pl.BlockSpec((tile_rows, LANES), row_map),
            ],
            out_specs=(acc_spec, acc_spec, acc_spec),
        ),
        compiler_params=pltpu.CompilerParams(
            dimension_semantics=("parallel", "arbitrary"),
            vmem_limit_bytes=48 * 1024 * 1024,
        ),
    )(pred2, tgt2)

    # Merge per-core / per-slot online-logsumexp partials and add the appended
    # zero logit of each branch via logaddexp(., 0) (robust to s == 0 / m large).
    big_m = jnp.max(m)                       # >= 0 because per-slot maxima start at 0
    w = jnp.exp(m - big_m)
    s_neg = jnp.sum(sneg * w)
    s_pos = jnp.sum(spos * w)
    neg_loss = jnp.logaddexp(big_m + jnp.log(s_neg), 0.0)
    pos_loss = jnp.logaddexp(big_m + jnp.log(s_pos), 0.0)
    return neg_loss + pos_loss


def _reference_numpy(logits, target, ignore_index=-100):
    """Pure-numpy (float64) replica of the PyTorch module for verification."""
    logits = np.asarray(logits, np.float64).ravel()
    target = np.asarray(target, np.int64).ravel()
    mask = target != ignore_index
    y_pred = logits[mask]
    y_true = target[mask].astype(np.float64)

    y_pred = (1.0 - 2.0 * y_true) * y_pred
    y_neg = np.concatenate([y_pred - y_true * 1e12, np.zeros((1,), np.float64)])
    y_pos = np.concatenate([y_pred - (1.0 - y_true) * 1e12, np.zeros((1,), np.float64)])

    def lse(x):
        mm = np.max(x)
        return mm + np.log(np.sum(np.exp(x - mm)))

    return lse(y_neg) + lse(y_pos)


if __name__ == "__main__":
    key = jax.random.PRNGKey(0)

    # case 1: numel % 1024 == 0  -> zero-copy (no-pad) path, full tiles
    # case 2: ragged numel       -> minimal-pad fallback + fully-masked core-1 tile
    for (B, S, T) in [(2, 128, 32), (2, 50, 27)]:
        k_pred, k_tgt, k_ign, key = jax.random.split(key, 4)
        logits = jax.random.normal(k_pred, (B, S, T), dtype=jnp.float32) * 3.0
        labels = jax.random.bernoulli(k_tgt, 0.3, (B, S, T)).astype(jnp.int32)
        ignore = jax.random.bernoulli(k_ign, 0.2, (B, S, T))
        target = jnp.where(ignore, -100, labels).astype(jnp.int32)

        loss = multi_label_categorical_cross_entropy(logits, target)
        loss = jax.block_until_ready(loss)

        ref = _reference_numpy(np.asarray(logits), np.asarray(target))
        np.testing.assert_allclose(np.asarray(loss, np.float64), ref, rtol=2e-4, atol=2e-4)

    print("KERNEL_OK")
</pallas_src>

<mosaic_0001>
module attributes {stable_mosaic.version = 11 : i64} {
  func.func @kernel(%arg0: i32, %arg1: i32, %arg2: memref<8x1024xf32, #tpu.memory_space<vmem>>, %arg3: memref<8x1024xi32, #tpu.memory_space<vmem>>, %arg4: memref<1x8x1024xf32, #tpu.memory_space<vmem>>, %arg5: memref<1x8x1024xf32, #tpu.memory_space<vmem>>, %arg6: memref<1x8x1024xf32, #tpu.memory_space<vmem>>) attributes {dimension_semantics = [#tpu.dimension_semantics<parallel>, #tpu.dimension_semantics<arbitrary>], iteration_bounds = array<i64: 2, 1>, scalar_prefetch = 0 : i64, scratch_operands = 0 : i64, tpu.core_type = #tpu.core_type<tc>, window_params = [{transform_indices = @transform_0, window_bounds = array<i64: 8, 1024>}, {transform_indices = @transform_1, window_bounds = array<i64: 8, 1024>}, {transform_indices = @transform_2, window_bounds = array<i64: 1, 8, 1024>}, {transform_indices = @transform_3, window_bounds = array<i64: 1, 8, 1024>}, {transform_indices = @transform_4, window_bounds = array<i64: 1, 8, 1024>}]} {
    %c0_i32 = arith.constant 0 : i32
    %0 = arith.cmpi eq, %arg1, %c0_i32 : i32
    %1 = arith.extui %0 : i1 to i32
    %c0_i32_0 = arith.constant 0 : i32
    %2 = arith.cmpi ne, %1, %c0_i32_0 : i32
    scf.if %2 {
      %cst_11 = arith.constant 0.000000e+00 : f32
      %24 = vector.broadcast %cst_11 : f32 to vector<1x8x1024xf32>
      %c0_12 = arith.constant 0 : index
      %c0_13 = arith.constant 0 : index
      %c0_14 = arith.constant 0 : index
      %25 = vector.load %arg4[%c0_12, %c0_13, %c0_14] : memref<1x8x1024xf32, #tpu.memory_space<vmem>>, vector<1x8x1024xf32>
      tpu.vector_store %arg4[%c0_12, %c0_13, %c0_14], %24 {strides = array<i32>} : memref<1x8x1024xf32, #tpu.memory_space<vmem>>, vector<1x8x1024xf32>,
      %cst_15 = arith.constant 0.000000e+00 : f32
      %26 = vector.broadcast %cst_15 : f32 to vector<1x8x1024xf32>
      %c0_16 = arith.constant 0 : index
      %c0_17 = arith.constant 0 : index
      %c0_18 = arith.constant 0 : index
      %27 = vector.load %arg5[%c0_16, %c0_17, %c0_18] : memref<1x8x1024xf32, #tpu.memory_space<vmem>>, vector<1x8x1024xf32>
      tpu.vector_store %arg5[%c0_16, %c0_17, %c0_18], %26 {strides = array<i32>} : memref<1x8x1024xf32, #tpu.memory_space<vmem>>, vector<1x8x1024xf32>,
      %cst_19 = arith.constant 0.000000e+00 : f32
      %28 = vector.broadcast %cst_19 : f32 to vector<1x8x1024xf32>
      %c0_20 = arith.constant 0 : index
      %c0_21 = arith.constant 0 : index
      %c0_22 = arith.constant 0 : index
      %29 = vector.load %arg6[%c0_20, %c0_21, %c0_22] : memref<1x8x1024xf32, #tpu.memory_space<vmem>>, vector<1x8x1024xf32>
      tpu.vector_store %arg6[%c0_20, %c0_21, %c0_22], %28 {strides = array<i32>} : memref<1x8x1024xf32, #tpu.memory_space<vmem>>, vector<1x8x1024xf32>,
    } else {
    }
    %c1_i32 = arith.constant 1 : i32
    %3 = arith.muli %arg0, %c1_i32 : i32
    %4 = arith.addi %3, %arg1 : i32
    %c8_i32 = arith.constant 8 : i32
    %5 = arith.muli %4, %c8_i32 : i32
    %c0 = arith.constant 0 : index
    %c0_1 = arith.constant 0 : index
    %6 = vector.load %arg2[%c0, %c0_1] : memref<8x1024xf32, #tpu.memory_space<vmem>>, vector<8x1024xf32>
    %c0_2 = arith.constant 0 : index
    %c0_3 = arith.constant 0 : index
    %7 = vector.load %arg3[%c0_2, %c0_3] : memref<8x1024xi32, #tpu.memory_space<vmem>>, vector<8x1024xi32>
    %c1_i32_4 = arith.constant 1 : i32
    %8 = vector.broadcast %c1_i32_4 : i32 to vector<8x1024xi32>
    %9 = arith.cmpi eq, %7, %8 : vector<8x1024xi32>
    %c0_i32_5 = arith.constant 0 : i32
    %10 = vector.broadcast %c0_i32_5 : i32 to vector<8x1024xi32>
    %11 = arith.cmpi eq, %7, %10 : vector<8x1024xi32>
    %cst = arith.constant 0.000000e+00 : f32
    %12 = vector.broadcast %cst : f32 to vector<8x1024xf32>
    %13 = arith.subf %12, %6 : vector<8x1024xf32>
    %cst_6 = arith.constant -9.99999995E+11 : f32
    %14 = vector.broadcast %cst_6 : f32 to vector<8x1024xf32>
    %15 = arith.select %9, %13, %14 : vector<8x1024xi1>, vector<8x1024xf32>
    %16 = arith.select %11, %6, %15 : vector<8x1024xi1>, vector<8x1024xf32>
    %c8_i32_7 = arith.constant 8 : i32
    %17 = arith.addi %5, %c8_i32_7 : i32
    %c8_i32_8 = arith.constant 8 : i32
    %18 = arith.cmpi sle, %17, %c8_i32_8 : i32
    %19 = arith.extui %18 : i1 to i32
    %c0_i32_9 = arith.constant 0 : i32
    %20 = arith.cmpi ne, %19, %c0_i32_9 : i32
    scf.if %20 {
      %24 = vector.shape_cast %16 : vector<8x1024xf32> to vector<1x8x1024xf32>
      %c0_11 = arith.constant 0 : index
      %c0_12 = arith.constant 0 : index
      %c0_13 = arith.constant 0 : index
      %25 = vector.load %arg4[%c0_11, %c0_12, %c0_13] : memref<1x8x1024xf32, #tpu.memory_space<vmem>>, vector<1x8x1024xf32>
      %26 = vector.shape_cast %25 : vector<1x8x1024xf32> to vector<8x1024xf32>
      %cst_14 = arith.constant dense<0xFF800000> : vector<8x1024xf32>
      %27 = vector.multi_reduction <maximumf>, %24, %cst_14 [0] : vector<1x8x1024xf32> to vector<8x1024xf32>
      %28 = arith.maximumf %26, %27 : vector<8x1024xf32>
      %29 = arith.subf %26, %28 : vector<8x1024xf32>
      %30 = math.exp %29 : vector<8x1024xf32>
      %31 = vector.shape_cast %28 : vector<8x1024xf32> to vector<1x8x1024xf32>
      %32 = arith.subf %24, %31 : vector<1x8x1024xf32>
      %33 = math.exp %32 : vector<1x8x1024xf32>
      %34 = vector.shape_cast %11 : vector<8x1024xi1> to vector<1x8x1024xi1>
      %cst_15 = arith.constant 0.000000e+00 : f32
      %35 = vector.broadcast %cst_15 : f32 to vector<1x8x1024xf32>
      %36 = arith.select %34, %33, %35 : vector<1x8x1024xi1>, vector<1x8x1024xf32>
      %c0_16 = arith.constant 0 : index
      %c0_17 = arith.constant 0 : index
      %c0_18 = arith.constant 0 : index
      %37 = vector.load %arg5[%c0_16, %c0_17, %c0_18] : memref<1x8x1024xf32, #tpu.memory_space<vmem>>, vector<1x8x1024xf32>
      %38 = vector.shape_cast %37 : vector<1x8x1024xf32> to vector<8x1024xf32>
      %39 = arith.mulf %38, %30 : vector<8x1024xf32>
      %cst_19 = arith.constant dense<0.000000e+00> : vector<8x1024xf32>
      %40 = vector.multi_reduction <add>, %36, %cst_19 [0] : vector<1x8x1024xf32> to vector<8x1024xf32>
      %41 = arith.addf %39, %40 : vector<8x1024xf32>
      %c0_20 = arith.constant 0 : index
      %c0_21 = arith.constant 0 : index
      %c0_22 = arith.constant 0 : index
      %42 = vector.load %arg5[%c0_20, %c0_21, %c0_22] : memref<1x8x1024xf32, #tpu.memory_space<vmem>>, vector<1x8x1024xf32>
      %43 = vector.shape_cast %42 : vector<1x8x1024xf32> to vector<8x1024xf32>
      %44 = vector.shape_cast %41 : vector<8x1024xf32> to vector<1x8x1024xf32>
      tpu.vector_store %arg5[%c0_20, %c0_21, %c0_22], %44 {strides = array<i32>} : memref<1x8x1024xf32, #tpu.memory_space<vmem>>, vector<1x8x1024xf32>,
      %c0_23 = arith.constant 0 : index
      %c0_24 = arith.constant 0 : index
      %c0_25 = arith.constant 0 : index
      %45 = vector.load %arg6[%c0_23, %c0_24, %c0_25] : memref<1x8x1024xf32, #tpu.memory_space<vmem>>, vector<1x8x1024xf32>
      %46 = vector.shape_cast %45 : vector<1x8x1024xf32> to vector<8x1024xf32>
      %47 = arith.mulf %46, %30 : vector<8x1024xf32>
      %48 = arith.subf %33, %36 : vector<1x8x1024xf32>
      %cst_26 = arith.constant dense<0.000000e+00> : vector<8x1024xf32>
      %49 = vector.multi_reduction <add>, %48, %cst_26 [0] : vector<1x8x1024xf32> to vector<8x1024xf32>
      %50 = arith.addf %47, %49 : vector<8x1024xf32>
      %c0_27 = arith.constant 0 : index
      %c0_28 = arith.constant 0 : index
      %c0_29 = arith.constant 0 : index
      %51 = vector.load %arg6[%c0_27, %c0_28, %c0_29] : memref<1x8x1024xf32, #tpu.memory_space<vmem>>, vector<1x8x1024xf32>
      %52 = vector.shape_cast %51 : vector<1x8x1024xf32> to vector<8x1024xf32>
      %53 = vector.shape_cast %50 : vector<8x1024xf32> to vector<1x8x1024xf32>
      tpu.vector_store %arg6[%c0_27, %c0_28, %c0_29], %53 {strides = array<i32>} : memref<1x8x1024xf32, #tpu.memory_space<vmem>>, vector<1x8x1024xf32>,
      %c0_30 = arith.constant 0 : index
      %c0_31 = arith.constant 0 : index
      %c0_32 = arith.constant 0 : index
      %54 = vector.load %arg4[%c0_30, %c0_31, %c0_32] : memref<1x8x1024xf32, #tpu.memory_space<vmem>>, vector<1x8x1024xf32>
      %55 = vector.shape_cast %54 : vector<1x8x1024xf32> to vector<8x1024xf32>
      %56 = vector.shape_cast %28 : vector<8x1024xf32> to vector<1x8x1024xf32>
      tpu.vector_store %arg4[%c0_30, %c0_31, %c0_32], %56 {strides = array<i32>} : memref<1x8x1024xf32, #tpu.memory_space<vmem>>, vector<1x8x1024xf32>,
    } else {
    }
    %true = arith.constant true
    %21 = arith.xori %18, %true : i1
    %22 = arith.extui %21 : i1 to i32
    %c0_i32_10 = arith.constant 0 : i32
    %23 = arith.cmpi ne, %22, %c0_i32_10 : i32
    scf.if %23 {
      %24 = tpu.iota {dimensions = array<i32: 0>} : vector<8x1024xi32>
      %25 = vector.broadcast %5 : i32 to vector<8x1024xi32>
      %26 = arith.addi %24, %25 : vector<8x1024xi32>
      %c8_i32_11 = arith.constant 8 : i32
      %27 = vector.broadcast %c8_i32_11 : i32 to vector<8x1024xi32>
      %28 = arith.cmpi slt, %26, %27 : vector<8x1024xi32>
      %cst_12 = arith.constant -9.99999995E+11 : f32
      %29 = vector.broadcast %cst_12 : f32 to vector<8x1024xf32>
      %30 = arith.select %28, %16, %29 : vector<8x1024xi1>, vector<8x1024xf32>
      %31 = vector.shape_cast %30 : vector<8x1024xf32> to vector<1x8x1024xf32>
      %c0_13 = arith.constant 0 : index
      %c0_14 = arith.constant 0 : index
      %c0_15 = arith.constant 0 : index
      %32 = vector.load %arg4[%c0_13, %c0_14, %c0_15] : memref<1x8x1024xf32, #tpu.memory_space<vmem>>, vector<1x8x1024xf32>
      %33 = vector.shape_cast %32 : vector<1x8x1024xf32> to vector<8x1024xf32>
      %cst_16 = arith.constant dense<0xFF800000> : vector<8x1024xf32>
      %34 = vector.multi_reduction <maximumf>, %31, %cst_16 [0] : vector<1x8x1024xf32> to vector<8x1024xf32>
      %35 = arith.maximumf %33, %34 : vector<8x1024xf32>
      %36 = arith.subf %33, %35 : vector<8x1024xf32>
      %37 = math.exp %36 : vector<8x1024xf32>
      %38 = vector.shape_cast %35 : vector<8x1024xf32> to vector<1x8x1024xf32>
      %39 = arith.subf %31, %38 : vector<1x8x1024xf32>
      %40 = math.exp %39 : vector<1x8x1024xf32>
      %41 = vector.shape_cast %11 : vector<8x1024xi1> to vector<1x8x1024xi1>
      %cst_17 = arith.constant 0.000000e+00 : f32
      %42 = vector.broadcast %cst_17 : f32 to vector<1x8x1024xf32>
      %43 = arith.select %41, %40, %42 : vector<1x8x1024xi1>, vector<1x8x1024xf32>
      %c0_18 = arith.constant 0 : index
      %c0_19 = arith.constant 0 : index
      %c0_20 = arith.constant 0 : index
      %44 = vector.load %arg5[%c0_18, %c0_19, %c0_20] : memref<1x8x1024xf32, #tpu.memory_space<vmem>>, vector<1x8x1024xf32>
      %45 = vector.shape_cast %44 : vector<1x8x1024xf32> to vector<8x1024xf32>
      %46 = arith.mulf %45, %37 : vector<8x1024xf32>
      %cst_21 = arith.constant dense<0.000000e+00> : vector<8x1024xf32>
      %47 = vector.multi_reduction <add>, %43, %cst_21 [0] : vector<1x8x1024xf32> to vector<8x1024xf32>
      %48 = arith.addf %46, %47 : vector<8x1024xf32>
      %c0_22 = arith.constant 0 : index
      %c0_23 = arith.constant 0 : index
      %c0_24 = arith.constant 0 : index
      %49 = vector.load %arg5[%c0_22, %c0_23, %c0_24] : memref<1x8x1024xf32, #tpu.memory_space<vmem>>, vector<1x8x1024xf32>
      %50 = vector.shape_cast %49 : vector<1x8x1024xf32> to vector<8x1024xf32>
      %51 = vector.shape_cast %48 : vector<8x1024xf32> to vector<1x8x1024xf32>
      tpu.vector_store %arg5[%c0_22, %c0_23, %c0_24], %51 {strides = array<i32>} : memref<1x8x1024xf32, #tpu.memory_space<vmem>>, vector<1x8x1024xf32>,
      %c0_25 = arith.constant 0 : index
      %c0_26 = arith.constant 0 : index
      %c0_27 = arith.constant 0 : index
      %52 = vector.load %arg6[%c0_25, %c0_26, %c0_27] : memref<1x8x1024xf32, #tpu.memory_space<vmem>>, vector<1x8x1024xf32>
      %53 = vector.shape_cast %52 : vector<1x8x1024xf32> to vector<8x1024xf32>
      %54 = arith.mulf %53, %37 : vector<8x1024xf32>
      %55 = arith.subf %40, %43 : vector<1x8x1024xf32>
      %cst_28 = arith.constant dense<0.000000e+00> : vector<8x1024xf32>
      %56 = vector.multi_reduction <add>, %55, %cst_28 [0] : vector<1x8x1024xf32> to vector<8x1024xf32>
      %57 = arith.addf %54, %56 : vector<8x1024xf32>
      %c0_29 = arith.constant 0 : index
      %c0_30 = arith.constant 0 : index
      %c0_31 = arith.constant 0 : index
      %58 = vector.load %arg6[%c0_29, %c0_30, %c0_31] : memref<1x8x1024xf32, #tpu.memory_space<vmem>>, vector<1x8x1024xf32>
      %59 = vector.shape_cast %58 : vector<1x8x1024xf32> to vector<8x1024xf32>
      %60 = vector.shape_cast %57 : vector<8x1024xf32> to vector<1x8x1024xf32>
      tpu.vector_store %arg6[%c0_29, %c0_30, %c0_31], %60 {strides = array<i32>} : memref<1x8x1024xf32, #tpu.memory_space<vmem>>, vector<1x8x1024xf32>,
      %c0_32 = arith.constant 0 : index
      %c0_33 = arith.constant 0 : index
      %c0_34 = arith.constant 0 : index
      %61 = vector.load %arg4[%c0_32, %c0_33, %c0_34] : memref<1x8x1024xf32, #tpu.memory_space<vmem>>, vector<1x8x1024xf32>
      %62 = vector.shape_cast %61 : vector<1x8x1024xf32> to vector<8x1024xf32>
      %63 = vector.shape_cast %35 : vector<8x1024xf32> to vector<1x8x1024xf32>
      tpu.vector_store %arg4[%c0_32, %c0_33, %c0_34], %63 {strides = array<i32>} : memref<1x8x1024xf32, #tpu.memory_space<vmem>>, vector<1x8x1024xf32>,
    } else {
    }
    return
  }
  func.func @transform_0(%arg0: i32, %arg1: i32) -> (i32, i32) {
    %c1_i32 = arith.constant 1 : i32
    %0 = arith.muli %arg0, %c1_i32 : i32
    %1 = arith.addi %0, %arg1 : i32
    %c0_i32 = arith.constant 0 : i32
    %2 = arith.minsi %1, %c0_i32 : i32
    %c0_i32_0 = arith.constant 0 : i32
    %c0_i32_1 = arith.constant 0 : i32
    return %2, %c0_i32_0 : i32, i32
  }
  func.func @transform_1(%arg0: i32, %arg1: i32) -> (i32, i32) {
    %c1_i32 = arith.constant 1 : i32
    %0 = arith.muli %arg0, %c1_i32 : i32
    %1 = arith.addi %0, %arg1 : i32
    %c0_i32 = arith.constant 0 : i32
    %2 = arith.minsi %1, %c0_i32 : i32
    %c0_i32_0 = arith.constant 0 : i32
    %c0_i32_1 = arith.constant 0 : i32
    return %2, %c0_i32_0 : i32, i32
  }
  func.func @transform_2(%arg0: i32, %arg1: i32) -> (i32, i32, i32) {
    %c0_i32 = arith.constant 0 : i32
    %c0_i32_0 = arith.constant 0 : i32
    %c0_i32_1 = arith.constant 0 : i32
    return %arg0, %c0_i32, %c0_i32_0 : i32, i32, i32
  }
  func.func @transform_3(%arg0: i32, %arg1: i32) -> (i32, i32, i32) {
    %c0_i32 = arith.constant 0 : i32
    %c0_i32_0 = arith.constant 0 : i32
    %c0_i32_1 = arith.constant 0 : i32
    return %arg0, %c0_i32, %c0_i32_0 : i32, i32, i32
  }
  func.func @transform_4(%arg0: i32, %arg1: i32) -> (i32, i32, i32) {
    %c0_i32 = arith.constant 0 : i32
    %c0_i32_0 = arith.constant 0 : i32
    %c0_i32_1 = arith.constant 0 : i32
    return %arg0, %c0_i32, %c0_i32_0 : i32, i32, i32
  }
}

</mosaic_0001>

<bundles_post_ra>
// kernel: tpu_custom_call.1
= control target key start
LH: loop header
LB: loop body
LE: loop exit
PB: predicated region body
PF: predicated region fallthrough
CT: control target
= control target key end

     0   :  { %s1965_s0 = inlined_call_operand.hbm [shape: f32[8,1024], index: 0, kind: input, shape index: {}]   ;;  %s1966_s1 = inlined_call_operand.hbm [shape: s32[8,1024], index: 1, kind: input, shape index: {}]   ;;  %s1967_s2 = inlined_call_operand.hbm [shape: f32[2,8,1024], index: 2, kind: output, shape index: {0}]   ;;  %s1968_s3 = inlined_call_operand.hbm [shape: f32[2,8,1024], index: 3, kind: output, shape index: {1}]   ;;  %s1969_s4 = inlined_call_operand.hbm [shape: f32[2,8,1024], index: 4, kind: output, shape index: {2}]  }
   0x1   :  { %1972 = sst [smem:[#allocation15_spill]] %s1965_s0 }
   0x2   :  { %10 = vsyncpa [#allocation3], 0 }
   0x3   :  { %12 = vsyncpa [#allocation3 + $0x1], 0 }
   0x4   :  { %13 = vsyncpa [#allocation6], 0 }
   0x5   :  { %15 = vsyncpa [#allocation6 + $0x1], 0 }
   0x6   :  { %16 = vsyncpa [#allocation4], 0 }
   0x7   :  { %18 = vsyncpa [#allocation4 + $0x1], 0 }
   0x8   :  { %19 = vsyncpa [#allocation9], 0 }
   0x9   :  { %21 = vsyncpa [#allocation9 + $0x1], 0  ;;  %s1433_s15 = smov 0   ;;  %s1435_s16 = smov 0  }
   0xa   :  { %s1437_s17 = smov 0   ;;  %s1439_s18 = smov 0  }
   0xb   :  { %s1441_s19 = smov 0   ;;  %s1443_s20 = smov 0  }
   0xc   :  { %s1445_s21 = smov 0   ;;  %s1447_s22 = smov 0  }
   0xd LB: > { %s1472_s23 = sadd.s32 4294967295, %s1403_s22   ;;  %s1970_s24 = sadd.s32 4294967294, %s1403_s22   ;;  %s1403_s22 = sphi %s1447_s22, %s27_s22   ;;  %s1399_s21 = sphi %s1445_s21, %s1987_s21   ;;  %s1395_s20 = sphi %s1443_s20, %s1986_s20   ;;  %s1391_s19 = sphi %s1441_s19, %s1955_s19   ;;  %s1387_s18 = sphi %s1439_s18, %s1985_s18   ;;  %s1383_s17 = sphi %s1437_s17, %s1984_s17   ;;  %s1379_s16 = sphi %s1435_s16, %s1983_s16   ;;  %s1375_s15 = sphi %s1433_s15, %s1982_s15  }
   0xe   : > { %s39_s25 = sadd.s32 1, %s1399_s21  ;;  %p1372_p1 = scmp.ne.s32.totalorder %s1391_s19, 0 }
   0xf   : > { %p41_p0 = scmp.ge.s32.totalorder %s39_s25, 2  ;;  %p60_p2 = scmp.eq.s32.totalorder %s1403_s22, 0 }
  0x10   : > { %p65_p3 = scmp.ne.s32.totalorder %s1391_s19, %s1387_s18  ;;  %p66_p5 = scmp.eq.s32.totalorder %s1472_s23, 0 }
  0x11   : > { %s1989_s25 = smov (%p41_p0, %s39_s25), 0  ;;  %p1481_p4 = por %p1372_p1, %p60_p2 }
  0x12   : > { %p1486_p6 = por %p66_p5, %p65_p3  ;;  %s107_s28 = ssub.s32 %s1399_s21, %s1989_s25 }
  0x13   : > { %p108_p7 = scmp.eq.s32.totalorder %s107_s28, 0  ;;  %s110_s29 = sadd.s32 1, %s1383_s17 }
  0x14   : > { %p120_p8 = scmp.ne.s32.totalorder %s1383_s17, %s1379_s16  ;;  %p121_p9 = scmp.eq.s32.totalorder %s1472_s23, 1 }
  0x15   : > { %s1494_s30 = scalar_select %p108_p7, %s1383_s17, %s110_s29  }
  0x16   : > { %p126_p10 = scmp.ne.s32.totalorder %s1379_s16, %s1375_s15  ;;  %p127_p11 = scmp.eq.s32.totalorder %s1970_s24, 1 }
  0x17   : > { %p1503_p12 = por %p121_p9, %p120_p8  ;;  %p978_p13 = scmp.ge.s32.totalorder %s1403_s22, 2 }
  0x18   : > { %p1508_p0 = por %p127_p11, %p126_p10  ;;  %p1037_p1 = scmp.lt.s32.totalorder %s1403_s22, 2 }
  0x19   : > { %s1977_s0 = sld [smem:[#allocation15_spill]]  ;;  %s1405_s10 = smov [#allocation2]  }
  0x1a   : > { %s215_s11 = sshll.u32 %s1405_s10, 4  ;;  %p1518_p2 = pnand %p1037_p1, %p1481_p4  ;;  %s216_s11 = int_to_ptr.vmem [resolvable:$true] %s215_s11 }
  0x1b   : > { %p985_p3 = scmp.ge.s32.totalorder %s1403_s22, 1  ;;  %p243_p5 = scmp.lt.s32.totalorder %s1403_s22, 3 }
  0x1c   : > { %p1180_p8 = pneg %p1518_p2 }
  0x1f   : > { %s213_s9 = sshll.u32 %s1977_s0, 4  ;;  %s1183_s28 = scalar_lea.hbm %s1977_s0, 64  ;;  %s214_s9 = int_to_ptr.hbm [resolvable:$true] %s213_s9 }
  0x20   : > { %s1176_s13 = sshra.s32 %s214_s9, 4  ;;  %s1177_s13 = int_to_ptr.hbm [resolvable:$true] %s1176_s13 }
  0x21   : > { %s1178_s14 = scalar_lea.hbm %s1177_s13, 64 }
  0x22   : > { %p1179_p7 = scmp.ne.s32.totalorder %s1177_s13, %s1178_s14  ;;  %p1185_p4 = scmp.lt.s32.totalorder %s1183_s28, %s1178_s14 }
  0x24   : > { %p1181_p9 = pnand %p1180_p8, %p1179_p7 }
  0x26   : > { %p1182_p10 = pneg %p1181_p9 }
  0x28   : > { %p1187_p11 = pnand %p1185_p4, %p1182_p10 }
  0x2a   : > { %1190 = shalt.err (!%p1187_p11)
}
  0x2b   : > { %1023 = dma.hbm_to_vmem [thread:$0]  (!%p1518_p2), %s214_s9, 1024, %s216_s11, [#allocation3]  }
  0x2c   : > { %p1538_p1 = pnand %p985_p3, %p243_p5  ;;  %s236_s10 = sshll.u32 %s1966_s1, 4  ;;  %s237_s10 = int_to_ptr.hbm [resolvable:$true] %s236_s10 }
  0x2d   : > { %s1406_s13 = smov [#allocation5]   ;;  %s1206_s18 = sshra.s32 %s237_s10, 4  ;;  %s1207_s18 = int_to_ptr.hbm [resolvable:$true] %s1206_s18 }
  0x2e   : > { %s238_s14 = sshll.u32 %s1406_s13, 4  ;;  %s1208_s26 = scalar_lea.hbm %s1207_s18, 64  ;;  %s239_s14 = int_to_ptr.vmem [resolvable:$true] %s238_s14 }
  0x2f   : > { %p1209_p7 = scmp.ne.s32.totalorder %s1207_s18, %s1208_s26  ;;  %s1213_s28 = scalar_lea.hbm %s1966_s1, 64 }
  0x30   : > { %p1215_p3 = scmp.lt.s32.totalorder %s1213_s28, %s1208_s26 }
  0x31   : > { %p1211_p9 = pnand %p1209_p7, %p1180_p8 }
  0x33   : > { %p1212_p10 = pneg %p1211_p9 }
  0x35   : > { %p1217_p5 = pnand %p1215_p3, %p1212_p10 }
  0x37   : > { %1220 = shalt.err (!%p1217_p5)
}
  0x38   : > { %1026 = dma.hbm_to_vmem [thread:$0]  (!%p1518_p2), %s237_s10, 1024, %s239_s14, [#allocation6]  }
  0x39   : > { %247 = sbr.rel (%p1538_p1) target bundleno = 219 (0xdb), region = 28  ;;  %s249_s7 = sand.u32 (!%p1538_p1), 1, %s1391_s19  }
  0x3a   : > { %s986_s8 = sshll.u32 (!%p1538_p1), %s249_s7, 6  ;;  %s250_s13 = scalar_lea.sflag (!%p1538_p1), [#allocation3], %s249_s7 }
  0x3b   : > { %s253_s18 = scalar_lea.vmem (!%p1538_p1), [#allocation2], %s986_s8 }
  0x3e   : > { %1357 = dma.done.wait (%p1486_p6), %s250_s13, 1024  }
  0x3f   : > { %1359 = vsyncadd (%p1486_p6), %s250_s13, 4294966272  ;;  %s260_s26 = scalar_lea.sflag [#allocation6], %s249_s7  ;;  %s1560_s9 = scalar_lea.vmem [#allocation5], %s986_s8 }
  0x40   : > { %1361 = dma.done.wait (%p1486_p6), %s260_s26, 1024  }
  0x41   : > { %1363 = vsyncadd (%p1486_p6), %s260_s26, 4294966272  ;;  %s1971_s12 = sand.u32 1, %s1379_s16   ;;  %s991_s29 = sshll.u32 %s1395_s20, 3  ;;  %v1407_v0 = vmov 0.0   ;;  %v340_v1 = vld [vmem:[%s253_s18] sm:$0xff]  ;;  %v341_v2 = vld [vmem:[%s253_s18 + $0x8] sm:$0xff] }
  0x42   : > { %s988_s10 = sshll.u32 %s1971_s12, 6  ;;  %s1572_s14 = sadd.s32 8, %s991_s29  ;;  %v342_v3 = vld [vmem:[%s253_s18 + $0x10] sm:$0xff]  ;;  %v343_v4 = vld [vmem:[%s253_s18 + $0x18] sm:$0xff]  ;;  %v344_v5 = vld [vmem:[%s253_s18 + $0x20] sm:$0xff]  ;;  %v372_v7 = vsub.f32 0.0, %v340_v1 }
  0x43   : > { %s1574_s11 = scalar_lea.vmem [#allocation7], %s988_s10  ;;  %v345_v6 = vld [vmem:[%s253_s18 + $0x28] sm:$0xff]  ;;  %v373_v8 = vsub.f32 0.0, %v341_v2  ;;  %v374_v9 = vsub.f32 0.0, %v342_v3  ;;  %s1586_s27 = scalar_lea.vmem [#allocation8], %s988_s10  ;;  %v346_v10 = vld [vmem:[%s253_s18 + $0x30] sm:$0xff] }
  0x44   : > { %314 = vst [vmem:[%s1574_s11] sm:$0xff] %v1407_v0  ;;  %v347_v11 = vld [vmem:[%s253_s18 + $0x38] sm:$0xff]  ;;  %v1591_v12 = vld [vmem:[%s1560_s9] sm:$0xff]  ;;  %v375_v13 = vsub.f32 0.0, %v343_v4  ;;  %v376_v14 = vsub.f32 0.0, %v344_v5  ;;  %v377_v15 = vsub.f32 0.0, %v345_v6  ;;  %s1593_s28 = scalar_lea.vmem [#allocation10], %s988_s10 }
  0x45   : > { %315 = vst [vmem:[%s1574_s11 + $0x8] sm:$0xff] %v1407_v0  ;;  %v1598_v16 = vld [vmem:[%s1560_s9 + $0x8] sm:$0xff]  ;;  %v1601_v17 = vld [vmem:[%s1560_s9 + $0x10] sm:$0xff]  ;;  %v1604_v18 = vld [vmem:[%s1560_s9 + $0x18] sm:$0xff]  ;;  %vm356_vm0 = vcmp.eq.s32.totalorder %v1591_v12, 1  ;;  %vm364_vm1 = vcmp.eq.s32.totalorder %v1591_v12, 0 }
  0x46   : > { %316 = vst [vmem:[%s1574_s11 + $0x10] sm:$0xff] %v1407_v0  ;;  %v378_v19 = vsub.f32 0.0, %v346_v10  ;;  %v1609_v20 = vld [vmem:[%s1560_s9 + $0x20] sm:$0xff]  ;;  %v1612_v21 = vld [vmem:[%s1560_s9 + $0x28] sm:$0xff]  ;;  %v1615_v22 = vld [vmem:[%s1560_s9 + $0x30] sm:$0xff]  ;;  %vm357_vm2 = vcmp.eq.s32.totalorder %v1598_v16, 1 }
  0x47   : > { %317 = vst [vmem:[%s1574_s11 + $0x18] sm:$0xff] %v1407_v0  ;;  %vm358_vm3 = vcmp.eq.s32.totalorder %v1601_v17, 1  ;;  %vm359_vm4 = vcmp.eq.s32.totalorder %v1604_v18, 1  ;;  %v1621_v23 = vld [vmem:[%s1560_s9 + $0x38] sm:$0xff]  ;;  %vm360_vm5 = vcmp.eq.s32.totalorder %v1609_v20, 1  ;;  %vm361_vm6 = vcmp.eq.s32.totalorder %v1612_v21, 1 }
  0x48   : > { %318 = vst [vmem:[%s1574_s11 + $0x20] sm:$0xff] %v1407_v0  ;;  %vm362_vm7 = vcmp.eq.s32.totalorder %v1615_v22, 1  ;;  %vm365_vm8 = vcmp.eq.s32.totalorder %v1598_v16, 0  ;;  %vm363_vm9 = vcmp.eq.s32.totalorder %v1621_v23, 1  ;;  %vm366_vm10 = vcmp.eq.s32.totalorder %v1601_v17, 0  ;;  %p992_p6 = scmp.gt.s32.totalorder %s1572_s14, 8 }
  0x49   : > { %322 = vst [vmem:[%s1586_s27] sm:$0xff] %v1407_v0  ;;  %vm367_vm11 = vcmp.eq.s32.totalorder %v1604_v18, 0  ;;  %vm368_vm12 = vcmp.eq.s32.totalorder %v1609_v20, 0  ;;  %vm369_vm13 = vcmp.eq.s32.totalorder %v1612_v21, 0  ;;  %vm370_vm14 = vcmp.eq.s32.totalorder %v1615_v22, 0 }
  0x4a   : > { %330 = vst [vmem:[%s1593_s28] sm:$0xff] %v1407_v0  ;;  %vm371_vm15 = vcmp.eq.s32.totalorder %v1621_v23, 0  ;;  %v379_v24 = vsub.f32 0.0, %v347_v11  ;;  %v380_v25 = vsel %vm356_vm0, %v372_v7, -1e+12  ;;  %v381_v26 = vsel %vm357_vm2, %v373_v8, -1e+12 }
  0x4b   : > { %319 = vst [vmem:[%s1574_s11 + $0x28] sm:$0xff] %v1407_v0  ;;  %v382_v27 = vsel %vm358_vm3, %v374_v9, -1e+12  ;;  %v383_v28 = vsel %vm359_vm4, %v375_v13, -1e+12  ;;  %v1654_v31 = vsel %vm364_vm1, %v340_v1, %v380_v25  ;;  %v1662_v34 = vsel %vm365_vm8, %v341_v2, %v381_v26 }
  0x4c   : > { %320 = vst [vmem:[%s1574_s11 + $0x30] sm:$0xff] %v1407_v0  ;;  %v384_v29 = vsel %vm360_vm5, %v376_v14, -1e+12  ;;  %v385_v30 = vsel %vm361_vm6, %v377_v15, -1e+12  ;;  %v1666_v35 = vsel %vm366_vm10, %v342_v3, %v382_v27  ;;  %v1672_v36 = vsel %vm367_vm11, %v343_v4, %v383_v28 }
  0x4d   : > { %321 = vst [vmem:[%s1574_s11 + $0x38] sm:$0xff] %v1407_v0  ;;  %v386_v32 = vsel %vm362_vm7, %v378_v19, -1e+12  ;;  %v387_v33 = vsel %vm363_vm9, %v379_v24, -1e+12  ;;  %v1676_v37 = vsel %vm368_vm12, %v344_v5, %v384_v29  ;;  %v1680_v38 = vsel %vm369_vm13, %v345_v6, %v385_v30 }
  0x4e   : > { %323 = vst [vmem:[%s1586_s27 + $0x8] sm:$0xff] %v1407_v0  ;;  %v1684_v39 = vsel %vm370_vm14, %v346_v10, %v386_v32  ;;  %v1690_v40 = vsel %vm371_vm15, %v347_v11, %v387_v33 }
  0x4f   : > { %324 = vst [vmem:[%s1586_s27 + $0x10] sm:$0xff] %v1407_v0 }
  0x50   : > { %325 = vst [vmem:[%s1586_s27 + $0x18] sm:$0xff] %v1407_v0 }
  0x51   : > { %326 = vst [vmem:[%s1586_s27 + $0x20] sm:$0xff] %v1407_v0 }
  0x52   : > { %327 = vst [vmem:[%s1586_s27 + $0x28] sm:$0xff] %v1407_v0 }
  0x53   : > { %328 = vst [vmem:[%s1586_s27 + $0x30] sm:$0xff] %v1407_v0 }
  0x54   : > { %329 = vst [vmem:[%s1586_s27 + $0x38] sm:$0xff] %v1407_v0 }
  0x55   : > { %331 = vst [vmem:[%s1593_s28 + $0x8] sm:$0xff] %v1407_v0 }
  0x56   : > { %332 = vst [vmem:[%s1593_s28 + $0x10] sm:$0xff] %v1407_v0 }
  0x57   : > { %333 = vst [vmem:[%s1593_s28 + $0x18] sm:$0xff] %v1407_v0  ;;  %400 = sbr.rel (%p992_p6) target bundleno = 127 (0x7f), region = 44 }
  0x58   : > { %334 = vst [vmem:[%s1593_s28 + $0x20] sm:$0xff] %v1407_v0 }
  0x59   : > { %335 = vst [vmem:[%s1593_s28 + $0x28] sm:$0xff] %v1407_v0 }
  0x5a   : > { %336 = vst [vmem:[%s1593_s28 + $0x30] sm:$0xff] %v1407_v0 }
  0x5b   : > { %337 = vst [vmem:[%s1593_s28 + $0x38] sm:$0xff] %v1407_v0 }
  0x5c   : > { %v401_v41 = vld [vmem:[%s1574_s11] sm:$0xff]  ;;  %v402_v42 = vld [vmem:[%s1574_s11 + $0x8] sm:$0xff]  ;;  %v403_v45 = vld [vmem:[%s1574_s11 + $0x10] sm:$0xff] }
  0x5d   : > { %v409_v43 = vmax.f32 %v401_v41, %v1654_v31  ;;  %v410_v44 = vmax.f32 %v402_v42, %v1662_v34  ;;  %v411_v46 = vmax.f32 %v403_v45, %v1666_v35  ;;  %v404_v47 = vld [vmem:[%s1574_s11 + $0x18] sm:$0xff]  ;;  %v405_v48 = vld [vmem:[%s1574_s11 + $0x20] sm:$0xff]  ;;  %v406_v53 = vld [vmem:[%s1574_s11 + $0x28] sm:$0xff] }
  0x5e   : > { %v412_v56 = vmax.f32 %v404_v47, %v1672_v36  ;;  %v413_v57 = vmax.f32 %v405_v48, %v1676_v37  ;;  %v414_v61 = vmax.f32 %v406_v53, %v1680_v38  ;;  %v407_v4 = vld [vmem:[%s1574_s11 + $0x30] sm:$0xff]  ;;  %v408_v7 = vld [vmem:[%s1574_s11 + $0x38] sm:$0xff]  ;;  %v473_v13 = vld [vmem:[%s1586_s27] sm:$0xff] }
  0x5f   : > { %v417_v49 = vsub.f32 %v401_v41, %v409_v43  ;;  %v441_v50 = vsub.f32 %v1654_v31, %v409_v43  ;;  %561 = vst [vmem:[%s1574_s11] sm:$0xff] %v409_v43  ;;  %v418_v51 = vsub.f32 %v402_v42, %v410_v44  ;;  %v442_v52 = vsub.f32 %v1662_v34, %v410_v44  ;;  %v474_v28 = vld [vmem:[%s1586_s27 + $0x8] sm:$0xff]  ;;  %v513_v33 = vld [vmem:[%s1593_s28] sm:$0xff] }
  0x60   : > { %562 = vst [vmem:[%s1574_s11 + $0x8] sm:$0xff] %v410_v44  ;;  %v419_v54 = vsub.f32 %v403_v45, %v411_v46  ;;  %v443_v55 = vsub.f32 %v1666_v35, %v411_v46  ;;  %v420_v0 = vsub.f32 %v404_v47, %v412_v56  ;;  %v444_v1 = vsub.f32 %v1672_v36, %v412_v56  ;;  %v514_v45 = vld [vmem:[%s1593_s28 + $0x8] sm:$0xff] }
  0x61   : > { %v425_v58 = vmul.f32 1.442695, %v417_v49  ;;  %v449_v59 = vmul.f32 1.442695, %v441_v50  ;;  %v427_v60 = vmul.f32 1.442695, %v418_v51  ;;  %v421_v2 = vsub.f32 %v405_v48, %v413_v57 }
  0x62   : > { %v451_v62 = vmul.f32 1.442695, %v442_v52  ;;  %v429_v63 = vmul.f32 1.442695, %v419_v54  ;;  %563 = vst [vmem:[%s1574_s11 + $0x10] sm:$0xff] %v411_v46  ;;  %v445_v3 = vsub.f32 %v1676_v37, %v413_v57  ;;  %v422_v6 = vsub.f32 %v406_v53, %v414_v61  ;;  %v475_v48 = vld [vmem:[%s1586_s27 + $0x10] sm:$0xff] }
  0x63   : > { %1112 = vpow2.f32 %v425_v58  ;;  %v453_v5 = vmul.f32 1.442695, %v443_v55  ;;  %564 = vst [vmem:[%s1574_s11 + $0x18] sm:$0xff] %v412_v56  ;;  %v431_v8 = vmul.f32 1.442695, %v420_v0  ;;  %v446_v9 = vsub.f32 %v1680_v38, %v414_v61  ;;  %v515_v55 = vld [vmem:[%s1593_s28 + $0x10] sm:$0xff] }
  0x64   : > { %1114 = vpow2.f32 %v449_v59  ;;  %v455_v10 = vmul.f32 1.442695, %v444_v1  ;;  %565 = vst [vmem:[%s1574_s11 + $0x20] sm:$0xff] %v413_v57  ;;  %v415_v11 = vmax.f32 %v407_v4, %v1684_v39  ;;  %v433_v14 = vmul.f32 1.442695, %v421_v2  ;;  %v476_v58 = vld [vmem:[%s1586_s27 + $0x18] sm:$0xff] }
  0x65   : > { %1116 = vpow2.f32 %v427_v60  ;;  %v457_v15 = vmul.f32 1.442695, %v445_v3  ;;  %566 = vst [vmem:[%s1574_s11 + $0x28] sm:$0xff] %v414_v61  ;;  %v416_v19 = vmax.f32 %v408_v7, %v1690_v40  ;;  %v435_v24 = vmul.f32 1.442695, %v422_v6  ;;  %v516_v1 = vld [vmem:[%s1593_s28 + $0x18] sm:$0xff] }
  0x66   : > { %1118 = vpow2.f32 %v451_v62  ;;  %v423_v25 = vsub.f32 %v407_v4, %v415_v11  ;;  %v447_v26 = vsub.f32 %v1684_v39, %v415_v11  ;;  %567 = vst [vmem:[%s1574_s11 + $0x30] sm:$0xff] %v415_v11  ;;  %v459_v29 = vmul.f32 1.442695, %v446_v9  ;;  %v477_v4 = vld [vmem:[%s1586_s27 + $0x20] sm:$0xff] }
  0x67   : > { %1120 = vpow2.f32 %v429_v63  ;;  %v424_v30 = vsub.f32 %v408_v7, %v416_v19  ;;  %v448_v32 = vsub.f32 %v1690_v40, %v416_v19  ;;  %568 = vst [vmem:[%s1574_s11 + $0x38] sm:$0xff] %v416_v19  ;;  %v517_v11 = vld [vmem:[%s1593_s28 + $0x20] sm:$0xff] }
  0x68   : > { %1122 = vpow2.f32 %v453_v5  ;;  %v437_v43 = vmul.f32 1.442695, %v423_v25  ;;  %v461_v44 = vmul.f32 1.442695, %v447_v26 }
  0x69   : > { %v1113_v27 = vpop.eup %1112  ;;  %1124 = vpow2.f32 %v431_v8  ;;  %v439_v49 = vmul.f32 1.442695, %v424_v30  ;;  %v463_v50 = vmul.f32 1.442695, %v448_v32 }
  0x6a   : > { %v1115_v41 = vpop.eup %1114  ;;  %v481_v42 = vmul.f32 %v1113_v27, %v473_v13  ;;  %1126 = vpow2.f32 %v455_v10  ;;  %v521_v54 = vmul.f32 %v1113_v27, %v513_v33  ;;  %v479_v33 = vld [vmem:[%s1586_s27 + $0x30] sm:$0xff] }
  0x6b   : > { %v1117_v46 = vpop.eup %1116  ;;  %v465_v47 = vsel %vm364_vm1, %v1115_v41, 0.0  ;;  %1128 = vpow2.f32 %v433_v14 }
  0x6c   : > { %v1119_v51 = vpop.eup %1118  ;;  %v497_v52 = vadd.f32 %v481_v42, %v465_v47  ;;  %v482_v53 = vmul.f32 %v1117_v46, %v474_v28  ;;  %1130 = vpow2.f32 %v457_v15  ;;  %v529_v59 = vsub.f32 %v1115_v41, %v465_v47  ;;  %v478_v15 = vld [vmem:[%s1586_s27 + $0x28] sm:$0xff] }
  0x6d   : > { %v1121_v56 = vpop.eup %1120  ;;  %v466_v57 = vsel %vm365_vm8, %v1119_v51, 0.0  ;;  %1132 = vpow2.f32 %v435_v24  ;;  %v522_v60 = vmul.f32 %v1117_v46, %v514_v45 }
  0x6e   : > { %v1123_v61 = vpop.eup %1122  ;;  %505 = vst [vmem:[%s1586_s27] sm:$0xff] %v497_v52  ;;  %v498_v62 = vadd.f32 %v482_v53, %v466_v57  ;;  %v483_v63 = vmul.f32 %v1121_v56, %v475_v48  ;;  %1134 = vpow2.f32 %v459_v29  ;;  %v530_v0 = vsub.f32 %v1119_v51, %v466_v57  ;;  %v518_v29 = vld [vmem:[%s1593_s28 + $0x28] sm:$0xff]  ;;  %v519_v48 = vld [vmem:[%s1593_s28 + $0x30] sm:$0xff]  ;;  %v480_v51 = vld [vmem:[%s1586_s27 + $0x38] sm:$0xff] }
  0x6f   : > { %v1125_v2 = vpop.eup %1124  ;;  %v467_v3 = vsel %vm366_vm10, %v1123_v61, 0.0  ;;  %1136 = vpow2.f32 %v437_v43  ;;  %v545_v5 = vadd.f32 %v529_v59, %v521_v54  ;;  %v523_v6 = vmul.f32 %v1121_v56, %v515_v55 }
  0x70   : > { %v1127_v7 = vpop.eup %1126  ;;  %506 = vst [vmem:[%s1586_s27 + $0x8] sm:$0xff] %v498_v62  ;;  %v499_v8 = vadd.f32 %v483_v63, %v467_v3  ;;  %v484_v9 = vmul.f32 %v1125_v2, %v476_v58  ;;  %1138 = vpow2.f32 %v461_v44  ;;  %v546_v10 = vadd.f32 %v530_v0, %v522_v60  ;;  %v520_v58 = vld [vmem:[%s1593_s28 + $0x38] sm:$0xff] }
  0x71   : > { %v1129_v13 = vpop.eup %1128  ;;  %v468_v14 = vsel %vm367_vm11, %v1127_v7, 0.0  ;;  %1140 = vpow2.f32 %v439_v49  ;;  %553 = vst [vmem:[%s1593_s28] sm:$0xff] %v545_v5  ;;  %v531_v19 = vsub.f32 %v1123_v61, %v467_v3  ;;  %v524_v24 = vmul.f32 %v1125_v2, %v516_v1 }
  0x72   : > { %v1131_v25 = vpop.eup %1130  ;;  %507 = vst [vmem:[%s1586_s27 + $0x10] sm:$0xff] %v499_v8  ;;  %v500_v26 = vadd.f32 %v484_v9, %v468_v14  ;;  %v485_v27 = vmul.f32 %v1129_v13, %v477_v4  ;;  %1142 = vpow2.f32 %v463_v50  ;;  %v532_v28 = vsub.f32 %v1127_v7, %v468_v14 }
  0x73   : > { %v1133_v30 = vpop.eup %1132  ;;  %v469_v32 = vsel %vm368_vm12, %v1131_v25, 0.0  ;;  %554 = vst [vmem:[%s1593_s28 + $0x8] sm:$0xff] %v546_v10  ;;  %v547_v41 = vadd.f32 %v531_v19, %v523_v6  ;;  %v525_v42 = vmul.f32 %v1129_v13, %v517_v11 }
  0x74   : > { %v1135_v43 = vpop.eup %1134  ;;  %508 = vst [vmem:[%s1586_s27 + $0x18] sm:$0xff] %v500_v26  ;;  %v501_v44 = vadd.f32 %v485_v27, %v469_v32  ;;  %v486_v45 = vmul.f32 %v1133_v30, %v478_v15  ;;  %v548_v46 = vadd.f32 %v532_v28, %v524_v24  ;;  %v533_v47 = vsub.f32 %v1131_v25, %v469_v32 }
  0x75   : > { %v1137_v49 = vpop.eup %1136  ;;  %v470_v50 = vsel %vm369_vm13, %v1135_v43, 0.0  ;;  %555 = vst [vmem:[%s1593_s28 + $0x10] sm:$0xff] %v547_v41  ;;  %v526_v52 = vmul.f32 %v1133_v30, %v518_v29 }
  0x76   : > { %v1139_v53 = vpop.eup %1138  ;;  %509 = vst [vmem:[%s1586_s27 + $0x20] sm:$0xff] %v501_v44  ;;  %v502_v54 = vadd.f32 %v486_v45, %v470_v50  ;;  %v487_v55 = vmul.f32 %v1137_v49, %v479_v33  ;;  %v549_v56 = vadd.f32 %v533_v47, %v525_v42  ;;  %v534_v57 = vsub.f32 %v1135_v43, %v470_v50 }
  0x77   : > { %v1141_v59 = vpop.eup %1140  ;;  %v471_v60 = vsel %vm370_vm14, %v1139_v53, 0.0  ;;  %556 = vst [vmem:[%s1593_s28 + $0x18] sm:$0xff] %v548_v46  ;;  %v527_v61 = vmul.f32 %v1137_v49, %v519_v48 }
  0x78   : > { %v1143_v62 = vpop.eup %1142  ;;  %510 = vst [vmem:[%s1586_s27 + $0x28] sm:$0xff] %v502_v54  ;;  %v503_v63 = vadd.f32 %v487_v55, %v471_v60  ;;  %v488_v0 = vmul.f32 %v1141_v59, %v480_v51  ;;  %v550_v1 = vadd.f32 %v534_v57, %v526_v52  ;;  %v535_v2 = vsub.f32 %v1139_v53, %v471_v60 }
  0x79   : > { %v472_v3 = vsel %vm371_vm15, %v1143_v62, 0.0  ;;  %557 = vst [vmem:[%s1593_s28 + $0x20] sm:$0xff] %v549_v56  ;;  %v528_v4 = vmul.f32 %v1141_v59, %v520_v58 }
  0x7a   : > { %511 = vst [vmem:[%s1586_s27 + $0x30] sm:$0xff] %v503_v63  ;;  %v504_v5 = vadd.f32 %v488_v0, %v472_v3  ;;  %v551_v6 = vadd.f32 %v535_v2, %v527_v61  ;;  %v536_v7 = vsub.f32 %v1143_v62, %v472_v3 }
  0x7b   : > { %558 = vst [vmem:[%s1593_s28 + $0x28] sm:$0xff] %v550_v1 }
  0x7c   : > { %512 = vst [vmem:[%s1586_s27 + $0x38] sm:$0xff] %v504_v5  ;;  %v552_v8 = vadd.f32 %v536_v7, %v528_v4 }
  0x7d   : > { %559 = vst [vmem:[%s1593_s28 + $0x30] sm:$0xff] %v551_v6 }
  0x7e   : > { %560 = vst [vmem:[%s1593_s28 + $0x38] sm:$0xff] %v552_v8 }
  0x7f PF: > { %p993_p2 = scmp.le.s32.totalorder %s1572_s14, 8 }
  0x81   : > { %572 = sbr.rel (%p993_p2) target bundleno = 176 (0xb0), region = 48 }
  0x86   : > { %v573_v9 = vlaneseq  ;;  %v575_v10 = vstv %s991_s29  ;;  %v586_v14 = vld [vmem:[%s1574_s11] sm:$0xff]  ;;  %v587_v15 = vld [vmem:[%s1574_s11 + $0x8] sm:$0xff]  ;;  %v588_v19 = vld [vmem:[%s1574_s11 + $0x10] sm:$0xff] }
  0x87   : > { %v589_v24 = vld [vmem:[%s1574_s11 + $0x18] sm:$0xff]  ;;  %v590_v42 = vld [vmem:[%s1574_s11 + $0x20] sm:$0xff]  ;;  %v591_v45 = vld [vmem:[%s1574_s11 + $0x28] sm:$0xff] }
  0x88   : > { %v574_v11 = vshrl.u32 %v573_v9, 7  ;;  %v592_v54 = vld [vmem:[%s1574_s11 + $0x30] sm:$0xff]  ;;  %v593_v61 = vld [vmem:[%s1574_s11 + $0x38] sm:$0xff]  ;;  %v658_v2 = vld [vmem:[%s1586_s27] sm:$0xff] }
  0x89   : > { %v698_v8 = vld [vmem:[%s1593_s28] sm:$0xff] }
  0x8a   : > { %v576_v13 = vadd.s32 %v575_v10, %v574_v11  ;;  %v662_v16 = vld [vmem:[%s1586_s27 + $0x20] sm:$0xff] }
  0x8c   : > { %vm577_vm0 = vcmp.lt.s32.totalorder %v576_v13, 8 }
  0x8d   : > { %v578_v25 = vsel %vm577_vm0, %v1654_v31, -1e+12  ;;  %v579_v26 = vsel %vm577_vm0, %v1662_v34, -1e+12  ;;  %v580_v27 = vsel %vm577_vm0, %v1666_v35, -1e+12 }
  0x8e   : > { %v594_v28 = vmax.f32 %v586_v14, %v578_v25  ;;  %v595_v29 = vmax.f32 %v587_v15, %v579_v26  ;;  %v596_v30 = vmax.f32 %v588_v19, %v580_v27  ;;  %v581_v32 = vsel %vm577_vm0, %v1672_v36, -1e+12 }
  0x8f   : > { %v597_v33 = vmax.f32 %v589_v24, %v581_v32  ;;  %v582_v41 = vsel %vm577_vm0, %v1676_v37, -1e+12  ;;  %v583_v31 = vsel %vm577_vm0, %v1680_v38, -1e+12  ;;  %v584_v53 = vsel %vm577_vm0, %v1684_v39, -1e+12 }
  0x90   : > { %v602_v43 = vsub.f32 %v586_v14, %v594_v28  ;;  %v626_v34 = vsub.f32 %v578_v25, %v594_v28  ;;  %746 = vst [vmem:[%s1574_s11] sm:$0xff] %v594_v28  ;;  %v603_v44 = vsub.f32 %v587_v15, %v595_v29  ;;  %v627_v35 = vsub.f32 %v579_v26, %v595_v29  ;;  %v699_v25 = vld [vmem:[%s1593_s28 + $0x8] sm:$0xff]  ;;  %v660_v28 = vld [vmem:[%s1586_s27 + $0x10] sm:$0xff] }
  0x91   : > { %747 = vst [vmem:[%s1574_s11 + $0x8] sm:$0xff] %v595_v29  ;;  %v604_v46 = vsub.f32 %v588_v19, %v596_v30  ;;  %v628_v47 = vsub.f32 %v580_v27, %v596_v30  ;;  %v605_v36 = vsub.f32 %v589_v24, %v597_v33  ;;  %v598_v50 = vmax.f32 %v590_v42, %v582_v41 }
  0x92   : > { %v610_v48 = vmul.f32 1.442695, %v602_v43  ;;  %v634_v49 = vmul.f32 1.442695, %v626_v34  ;;  %v612_v37 = vmul.f32 1.442695, %v603_v44  ;;  %v629_v38 = vsub.f32 %v581_v32, %v597_v33 }
  0x93   : > { %v636_v51 = vmul.f32 1.442695, %v627_v35  ;;  %v599_v52 = vmax.f32 %v591_v45, %v583_v31  ;;  %v614_v55 = vmul.f32 1.442695, %v604_v46  ;;  %v638_v56 = vmul.f32 1.442695, %v628_v47 }
  0x94   : > { %1144 = vpow2.f32 %v610_v48  ;;  %748 = vst [vmem:[%s1574_s11 + $0x10] sm:$0xff] %v596_v30  ;;  %v606_v57 = vsub.f32 %v590_v42, %v598_v50  ;;  %v616_v58 = vmul.f32 1.442695, %v605_v36  ;;  %v630_v59 = vsub.f32 %v582_v41, %v598_v50  ;;  %v661_v44 = vld [vmem:[%s1586_s27 + $0x18] sm:$0xff] }
  0x95   : > { %1146 = vpow2.f32 %v634_v49  ;;  %749 = vst [vmem:[%s1574_s11 + $0x18] sm:$0xff] %v597_v33  ;;  %v607_v60 = vsub.f32 %v591_v45, %v599_v52  ;;  %v631_v62 = vsub.f32 %v583_v31, %v599_v52  ;;  %v600_v39 = vmax.f32 %v592_v54, %v584_v53  ;;  %v700_v31 = vld [vmem:[%s1593_s28 + $0x10] sm:$0xff]  ;;  %v701_v48 = vld [vmem:[%s1593_s28 + $0x18] sm:$0xff] }
  0x96   : > { %1148 = vpow2.f32 %v612_v37  ;;  %750 = vst [vmem:[%s1574_s11 + $0x20] sm:$0xff] %v598_v50  ;;  %v585_v63 = vsel %vm577_vm0, %v1690_v40, -1e+12  ;;  %v640_v0 = vmul.f32 1.442695, %v629_v38  ;;  %v659_v40 = vld [vmem:[%s1586_s27 + $0x8] sm:$0xff] }
  0x97   : > { %1150 = vpow2.f32 %v636_v51  ;;  %v618_v1 = vmul.f32 1.442695, %v606_v57  ;;  %751 = vst [vmem:[%s1574_s11 + $0x28] sm:$0xff] %v599_v52  ;;  %v608_v3 = vsub.f32 %v592_v54, %v600_v39  ;;  %v632_v4 = vsub.f32 %v584_v53, %v600_v39  ;;  %v663_v57 = vld [vmem:[%s1586_s27 + $0x28] sm:$0xff] }
  0x98   : > { %1152 = vpow2.f32 %v614_v55  ;;  %v601_v5 = vmax.f32 %v593_v61, %v585_v63  ;;  %v642_v6 = vmul.f32 1.442695, %v630_v59  ;;  %v620_v7 = vmul.f32 1.442695, %v607_v60  ;;  %752 = vst [vmem:[%s1574_s11 + $0x30] sm:$0xff] %v600_v39  ;;  %v702_v55 = vld [vmem:[%s1593_s28 + $0x20] sm:$0xff] }
  0x99   : > { %1154 = vpow2.f32 %v638_v56  ;;  %v644_v10 = vmul.f32 1.442695, %v631_v62  ;;  %v622_v11 = vmul.f32 1.442695, %v608_v3  ;;  %v646_v19 = vmul.f32 1.442695, %v632_v4 }
  0x9a   : > { %v1145_v9 = vpop.eup %1144  ;;  %1156 = vpow2.f32 %v616_v58  ;;  %v609_v13 = vsub.f32 %v593_v61, %v601_v5  ;;  %753 = vst [vmem:[%s1574_s11 + $0x38] sm:$0xff] %v601_v5  ;;  %v633_v24 = vsub.f32 %v585_v63, %v601_v5  ;;  %v703_v63 = vld [vmem:[%s1593_s28 + $0x28] sm:$0xff] }
  0x9b   : > { %v1147_v14 = vpop.eup %1146  ;;  %v666_v15 = vmul.f32 %v1145_v9, %v658_v2  ;;  %1158 = vpow2.f32 %v640_v0  ;;  %v706_v30 = vmul.f32 %v1145_v9, %v698_v8  ;;  %v704_v9 = vld [vmem:[%s1593_s28 + $0x30] sm:$0xff] }
  0x9c   : > { %v1149_v26 = vpop.eup %1148  ;;  %v650_v27 = vsel %vm364_vm1, %v1147_v14, 0.0  ;;  %1160 = vpow2.f32 %v618_v1  ;;  %v624_v29 = vmul.f32 1.442695, %v609_v13  ;;  %v648_v42 = vmul.f32 1.442695, %v633_v24  ;;  %v664_v1 = vld [vmem:[%s1586_s27 + $0x30] sm:$0xff] }
  0x9d   : > { %v1151_v32 = vpop.eup %1150  ;;  %v682_v33 = vadd.f32 %v666_v15, %v650_v27  ;;  %v667_v41 = vmul.f32 %v1149_v26, %v659_v40  ;;  %1162 = vpow2.f32 %v642_v6  ;;  %v714_v12 = vsub.f32 %v1147_v14, %v650_v27 }
  0x9e   : > { %v1153_v43 = vpop.eup %1152  ;;  %v651_v34 = vsel %vm365_vm8, %v1151_v32, 0.0  ;;  %1164 = vpow2.f32 %v620_v7  ;;  %v707_v35 = vmul.f32 %v1149_v26, %v699_v25  ;;  %v705_v25 = vld [vmem:[%s1593_s28 + $0x38] sm:$0xff] }
  0x9f   : > { %v1155_v45 = vpop.eup %1154  ;;  %690 = vst [vmem:[%s1586_s27] sm:$0xff] %v682_v33  ;;  %v683_v46 = vadd.f32 %v667_v41, %v651_v34  ;;  %v668_v47 = vmul.f32 %v1153_v43, %v660_v28  ;;  %1166 = vpow2.f32 %v644_v10  ;;  %v715_v36 = vsub.f32 %v1151_v32, %v651_v34  ;;  %v665_v10 = vld [vmem:[%s1586_s27 + $0x38] sm:$0xff] }
  0xa0   : > { %v1157_v49 = vpop.eup %1156  ;;  %v652_v37 = vsel %vm366_vm10, %v1155_v45, 0.0  ;;  %1168 = vpow2.f32 %v622_v11  ;;  %v730_v50 = vadd.f32 %v714_v12, %v706_v30  ;;  %v708_v51 = vmul.f32 %v1153_v43, %v700_v31 }
  0xa1   : > { %v1159_v38 = vpop.eup %1158  ;;  %691 = vst [vmem:[%s1586_s27 + $0x8] sm:$0xff] %v683_v46  ;;  %v684_v52 = vadd.f32 %v668_v47, %v652_v37  ;;  %v669_v53 = vmul.f32 %v1157_v49, %v661_v44  ;;  %1170 = vpow2.f32 %v646_v19  ;;  %v731_v54 = vadd.f32 %v715_v36, %v707_v35 }
  0xa2   : > { %v1161_v56 = vpop.eup %1160  ;;  %v653_v17 = vsel %vm367_vm11, %v1159_v38, 0.0  ;;  %1172 = vpow2.f32 %v624_v29  ;;  %738 = vst [vmem:[%s1593_s28] sm:$0xff] %v730_v50  ;;  %v716_v58 = vsub.f32 %v1155_v45, %v652_v37  ;;  %v709_v59 = vmul.f32 %v1157_v49, %v701_v48 }
  0xa3   : > { %v1163_v60 = vpop.eup %1162  ;;  %692 = vst [vmem:[%s1586_s27 + $0x10] sm:$0xff] %v684_v52  ;;  %v685_v61 = vadd.f32 %v669_v53, %v653_v17  ;;  %v670_v62 = vmul.f32 %v1161_v56, %v662_v16  ;;  %1174 = vpow2.f32 %v648_v42  ;;  %v717_v39 = vsub.f32 %v1159_v38, %v653_v17 }
  0xa4   : > { %v1165_v0 = vpop.eup %1164  ;;  %v654_v18 = vsel %vm368_vm12, %v1163_v60, 0.0  ;;  %739 = vst [vmem:[%s1593_s28 + $0x8] sm:$0xff] %v731_v54  ;;  %v732_v2 = vadd.f32 %v716_v58, %v708_v51  ;;  %v710_v3 = vmul.f32 %v1161_v56, %v702_v55 }
  0xa5   : > { %v1167_v4 = vpop.eup %1166  ;;  %693 = vst [vmem:[%s1586_s27 + $0x18] sm:$0xff] %v685_v61  ;;  %v686_v5 = vadd.f32 %v670_v62, %v654_v18  ;;  %v671_v6 = vmul.f32 %v1165_v0, %v663_v57  ;;  %v733_v7 = vadd.f32 %v717_v39, %v709_v59  ;;  %v718_v8 = vsub.f32 %v1163_v60, %v654_v18 }
  0xa6   : > { %v1169_v40 = vpop.eup %1168  ;;  %v655_v20 = vsel %vm369_vm13, %v1167_v4, 0.0  ;;  %740 = vst [vmem:[%s1593_s28 + $0x10] sm:$0xff] %v732_v2  ;;  %v711_v11 = vmul.f32 %v1165_v0, %v703_v63 }
  0xa7   : > { %v1171_v13 = vpop.eup %1170  ;;  %694 = vst [vmem:[%s1586_s27 + $0x20] sm:$0xff] %v686_v5  ;;  %v687_v14 = vadd.f32 %v671_v6, %v655_v20  ;;  %v672_v15 = vmul.f32 %v1169_v40, %v664_v1  ;;  %v734_v19 = vadd.f32 %v718_v8, %v710_v3  ;;  %v719_v24 = vsub.f32 %v1167_v4, %v655_v20 }
  0xa8   : > { %v1173_v26 = vpop.eup %1172  ;;  %v656_v27 = vsel %vm370_vm14, %v1171_v13, 0.0  ;;  %741 = vst [vmem:[%s1593_s28 + $0x18] sm:$0xff] %v733_v7  ;;  %v712_v21 = vmul.f32 %v1169_v40, %v704_v9 }
  0xa9   : > { %v1175_v28 = vpop.eup %1174  ;;  %695 = vst [vmem:[%s1586_s27 + $0x28] sm:$0xff] %v687_v14  ;;  %v688_v29 = vadd.f32 %v672_v15, %v656_v27  ;;  %v673_v30 = vmul.f32 %v1173_v26, %v665_v10  ;;  %v735_v32 = vadd.f32 %v719_v24, %v711_v11  ;;  %v720_v33 = vsub.f32 %v1171_v13, %v656_v27 }
  0xaa   : > { %v657_v41 = vsel %vm371_vm15, %v1175_v28, 0.0  ;;  %742 = vst [vmem:[%s1593_s28 + $0x20] sm:$0xff] %v734_v19  ;;  %v713_v42 = vmul.f32 %v1173_v26, %v705_v25 }
  0xab   : > { %696 = vst [vmem:[%s1586_s27 + $0x30] sm:$0xff] %v688_v29  ;;  %v689_v22 = vadd.f32 %v673_v30, %v657_v41  ;;  %v736_v31 = vadd.f32 %v720_v33, %v712_v21  ;;  %v721_v43 = vsub.f32 %v1175_v28, %v657_v41 }
  0xac   : > { %743 = vst [vmem:[%s1593_s28 + $0x28] sm:$0xff] %v735_v32 }
  0xad   : > { %697 = vst [vmem:[%s1586_s27 + $0x38] sm:$0xff] %v689_v22  ;;  %v737_v34 = vadd.f32 %v721_v43, %v713_v42 }
  0xae   : > { %744 = vst [vmem:[%s1593_s28 + $0x30] sm:$0xff] %v736_v31 }
  0xaf   : > { %745 = vst [vmem:[%s1593_s28 + $0x38] sm:$0xff] %v737_v34 }
  0xb0 PF: > { %s759_s7 = sand.u32 1, %s1472_s23   ;;  %s1882_s8 = sshll.u32 %s1395_s20, 6 }
  0xb1   : > { %s791_s26 = scalar_lea.hbm %s1968_s3, %s1882_s8  ;;  %s793_s9 = sshll.u32 %s1586_s27, 4  ;;  %s794_s9 = int_to_ptr.vmem [resolvable:$true] %s793_s9 }
  0xb2   : > { %s795_s29 = sshll.u32 %s791_s26, 4  ;;  %s1889_s10 = scalar_lea.sflag [#allocation9], %s759_s7  ;;  %s796_s29 = int_to_ptr.hbm [resolvable:$true] %s795_s29 }
  0xb3   : > { %s1250_s14 = sshra.s32 %s796_s29, 4  ;;  %s1256_s12 = scalar_lea.hbm %s1968_s3, 128  ;;  %s1251_s14 = int_to_ptr.hbm [resolvable:$true] %s1250_s14 }
  0xb4   : > { %s1252_s24 = scalar_lea.hbm %s1251_s14, 64  ;;  %p1257_p1 = scmp.lt.s32.totalorder %s1251_s14, %s1968_s3 }
  0xb5   : > { %p1253_p8 = scmp.ne.s32.totalorder %s1251_s14, %s1252_s24  ;;  %p1258_p7 = scmp.lt.s32.totalorder %s1256_s12, %s1252_s24 }
  0xb7   : > { %p1254_p4 = pnand %p1253_p8, %p1503_p12  ;;  %p1259_p9 = por %p1258_p7, %p1257_p1 }
  0xb9   : > { %p1255_p11 = pneg %p1254_p4 }
  0xbb   : > { %p1260_p10 = pnand %p1259_p9, %p1255_p11 }
  0xbd   : > { %1263 = shalt.err (!%p1260_p10)
}
  0xbe   : > { %1015 = dma.vmem_to_hbm [thread:$0]  (%p1503_p12), %s794_s9, 1024, %s796_s29, %s1889_s10  }
  0xbf   : > { %s776_s18 = scalar_lea.hbm %s1967_s2, %s1882_s8  ;;  %s778_s26 = sshll.u32 %s1574_s11, 4  ;;  %s779_s26 = int_to_ptr.vmem [resolvable:$true] %s778_s26 }
  0xc0   : > { %s780_s20 = sshll.u32 %s776_s18, 4  ;;  %s1980_s0 = sand.u32 1, %s1379_s16   ;;  %s781_s20 = int_to_ptr.hbm [resolvable:$true] %s780_s20 }
  0xc1   : > { %s755_s24 = scalar_lea.sflag [#allocation4], %s1980_s0  ;;  %s1278_s12 = sshra.s32 %s781_s20, 4  ;;  %s1279_s12 = int_to_ptr.hbm [resolvable:$true] %s1278_s12 }
  0xc2   : > { %s1280_s14 = scalar_lea.hbm %s1279_s12, 64  ;;  %s1284_s9 = scalar_lea.hbm %s1967_s2, 128 }
  0xc3   : > { %p1281_p3 = scmp.ne.s32.totalorder %s1279_s12, %s1280_s14  ;;  %p1285_p2 = scmp.lt.s32.totalorder %s1279_s12, %s1967_s2 }
  0xc4   : > { %p1286_p8 = scmp.lt.s32.totalorder %s1284_s9, %s1280_s14 }
  0xc5   : > { %p1282_p5 = pnand %p1281_p3, %p1503_p12 }
  0xc6   : > { %p1287_p4 = por %p1286_p8, %p1285_p2 }
  0xc7   : > { %p1283_p6 = pneg %p1282_p5 }
  0xc9   : > { %p1288_p11 = pnand %p1287_p4, %p1283_p6 }
  0xcb   : > { %1291 = shalt.err (!%p1288_p11)
}
  0xcc   : > { %1014 = dma.vmem_to_hbm [thread:$0]  (%p1503_p12), %s779_s26, 1024, %s781_s20, %s755_s24  }
  0xcd   : > { %s806_s18 = scalar_lea.hbm %s1969_s4, %s1882_s8  ;;  %s808_s0 = sshll.u32 %s1593_s28, 4  ;;  %s809_s0 = int_to_ptr.vmem [resolvable:$true] %s808_s0 }
  0xce   : > { %s810_s23 = sshll.u32 %s806_s18, 4  ;;  %s1312_s29 = scalar_lea.hbm %s1969_s4, 128  ;;  %s811_s23 = int_to_ptr.hbm [resolvable:$true] %s810_s23 }
  0xcf   : > { %s1306_s13 = sshra.s32 %s811_s23, 4  ;;  %s1307_s13 = int_to_ptr.hbm [resolvable:$true] %s1306_s13 }
  0xd0   : > { %s1308_s12 = scalar_lea.hbm %s1307_s13, 64  ;;  %p1313_p10 = scmp.lt.s32.totalorder %s1307_s13, %s1969_s4 }
  0xd1   : > { %p1309_p1 = scmp.ne.s32.totalorder %s1307_s13, %s1308_s12  ;;  %p1314_p3 = scmp.lt.s32.totalorder %s1312_s29, %s1308_s12 }
  0xd3   : > { %p1310_p7 = pnand %p1309_p1, %p1503_p12  ;;  %p1315_p5 = por %p1314_p3, %p1313_p10 }
  0xd5   : > { %p1311_p9 = pneg %p1310_p7 }
  0xd7   : > { %p1316_p6 = pnand %p1315_p5, %p1311_p9 }
  0xd9   : > { %1319 = shalt.err (!%p1316_p6)
}
  0xda   : > { %1016 = dma.vmem_to_hbm [thread:$0]  (%p1503_p12), %s809_s0, 1024, %s811_s23, %s1889_s10  }
  0xdb PF: > { %s822_s28 = sand.u32 1, %s1375_s15   ;;  %p1028_p2 = pnand %p978_p13, %p1508_p0 }
  0xdc   : > { %s823_s8 = scalar_lea.sflag [#allocation4], %s822_s28 }
  0xdd   : > { %p1029_p8 = pneg %p1028_p2 }
  0xdf   : > { %1365 = dma.done.wait (%p1029_p8), %s823_s8, 1024  }
  0xe0   : > { %1367 = vsyncadd (%p1029_p8), %s823_s8, 4294966272  ;;  %s1981_s24 = sadd.s32 4294967294, %s1403_s22  }
  0xe1   : > { %s832_s27 = sand.u32 1, %s1981_s24  }
  0xe2   : > { %s833_s11 = scalar_lea.sflag [#allocation9], %s832_s27 }
  0xe3   : > { %1369 = dma.done.wait (%p1029_p8), %s833_s11, 2048  }
  0xe4   : > { %1371 = vsyncadd (%p1029_p8), %s833_s11, 4294965248  ;;  %s27_s22 = sadd.s32 1, %s1403_s22   ;;  %s1982_s15 = smov %s1379_s16 }
  0xe5   : > { %p24_p12 = scmp.ge.s32.totalorder %s27_s22, 4   ;;  %s1983_s16 = smov %s1383_s17 }
  0xe6   : > { %s1984_s17 = smov %s1494_s30  ;;  %s1985_s18 = smov %s1391_s19 }
  0xe7   : > { %s1955_s19 = smov 0   ;;  %s1986_s20 = smov %s1399_s21 }
  0xe8   : > { %s1987_s21 = smov %s1989_s25  ;;  %26 = sbr.rel (!%p24_p12) target bundleno = 13 (0xd), region = 130 }
  0xed   :  { %849 = vsyncpa [#allocation3], 1 }
  0xee   :  { %851 = vsyncpa [#allocation3 + $0x1], 1 }
  0xef   :  { %852 = vsyncpa [#allocation6], 1 }
  0xf0   :  { %854 = vsyncpa [#allocation6 + $0x1], 1 }
  0xf1   :  { %855 = vsyncpa [#allocation4], 1 }
  0xf2   :  { %857 = vsyncpa [#allocation4 + $0x1], 1 }
  0xf3   :  { %858 = vsyncpa [#allocation9], 1 }
  0xf4   :  { %860 = vsyncpa [#allocation9 + $0x1], 1 }

</bundles_post_ra>
